<compile_context>
chip_gen: v5e
topology: v5e:2x2
jax: 0.10.0
libtpu: 0.0.40
codegen_flags: <defaults>
</compile_context>

<pallas_src>
import jax
import jax.numpy as jnp
from jax.experimental import pallas as pl
from jax.experimental.pallas import tpu as pltpu


def _round_up(x, m):
    return (x + m - 1) // m * m


def _cdiv(a, b):
    return -(-a // b)


def _physical_vmem_bytes():
    """Per-core VMEM capacity; conservative (v7x) fallback if the query fails."""
    try:
        return int(pltpu.get_tpu_info().vmem_capacity_bytes)
    except Exception:
        return 64 * 1024 * 1024


def _choose_row_tiling(n, target_tm):
    """RoI-axis tiling: multiple of 16, n_tiles small (and even when > 1)."""
    n16 = _round_up(max(n, 1), 16)
    if n16 <= target_tm:
        # Enough rows to feed both v7x TensorCores? Then split into two tiles.
        n_tiles = 2 if n16 >= 512 else 1
    else:
        n_tiles = _cdiv(n16, target_tm)
        if n_tiles % 2:            # keep the parallel axis splittable across 2 TCs
            n_tiles += 1
    tm = _round_up(_cdiv(n16, n_tiles), 16)
    return tm, tm * n_tiles, n_tiles


def _fast_rcnn_predictor_kernel(
    x_ref,        # (TM, TK)        input dtype (cast to compute dtype in-kernel)
    w1_ref,       # (TK, MIDp)      compute dtype
    b1_ref,       # (1, MIDp)       f32
    w2_ref,       # (MIDp, MIDp)    compute dtype
    b2_ref,       # (1, MIDp)       f32
    wh_ref,       # (MIDp, Cp)      compute dtype, fused [cls | bbox] head
    bh_ref,       # (1, Cp)         f32
    out_ref,      # (TM, Cp)        f32
    h1_acc,       # (TM, MIDp)      f32 scratch (fc1 accumulator)
):
    k = pl.program_id(1)

    @pl.when(k == 0)
    def _():
        # Seed the accumulator with the fc1 bias (saves an add in the epilogue).
        h1_acc[...] = jnp.broadcast_to(b1_ref[...], h1_acc.shape)

    # fc1 partial product over the K (reduction) grid axis.
    h1_acc[...] += jnp.dot(x_ref[...].astype(w1_ref.dtype), w1_ref[...],
                           preferred_element_type=jnp.float32)

    @pl.when(k == pl.num_programs(1) - 1)
    def _():
        # ReLU in f32, then back to the compute dtype for the MXU.
        h1 = jnp.maximum(h1_acc[...], 0.0).astype(w2_ref.dtype)

        # fc2 + ReLU
        h2 = jnp.dot(h1, w2_ref[...], preferred_element_type=jnp.float32)
        h2 = jnp.maximum(h2 + b2_ref[...], 0.0).astype(wh_ref.dtype)

        # fused (cls | bbox) head, lane-dense 128-padded output.
        out = jnp.dot(h2, wh_ref[...], preferred_element_type=jnp.float32)
        out_ref[...] = (out + bh_ref[...]).astype(out_ref.dtype)


def fast_rcnn_predictor(x, params, *, tm=512, tk=2048,
                        compute_dtype=jnp.bfloat16):
    """FastRCNNPredictor forward.

    x: (N, ...) -> flattened to (N, in_channels) like torch's x.flatten(1).
    params: dict w1,b1,w2,b2,w_cls,b_cls,w_bbox,b_bbox with W in (in, out)
            layout and biases (1, out).
    Returns (score, bbox_delta): (N, num_classes), (N, 4*num_classes), f32.
    """
    n = x.shape[0]
    x2 = x.reshape(n, -1)
    k_dim = x2.shape[1]
    mid = params["w1"].shape[1]
    num_classes = params["w_cls"].shape[1]

    # ---- padded / tiled dims (MXU- and vst-friendly) -----------------------
    mid_p = _round_up(mid, 128)
    c_out = 5 * num_classes                       # fused [cls | bbox] width
    c_p = _round_up(c_out, 128)
    k128 = _round_up(k_dim, 128)
    tm, n_p, n_tiles = _choose_row_tiling(n, tm)

    # ---- generation-aware VMEM budget --------------------------------------
    phys_vmem = _physical_vmem_bytes()
    vmem_limit = phys_vmem * 3 // 4               # 96 MiB v5e/v6e, 48 MiB v7x

    wsz = jnp.dtype(compute_dtype).itemsize
    x_sz = jnp.dtype(x2.dtype).itemsize

    # Estimate VMEM for the fully-resident-w1 form (single K step):
    resident_bytes = (
        k128 * mid_p * wsz                        # w1, single buffer
        + 2 * tm * k128 * x_sz                    # x slab, double-buffered
        + mid_p * mid_p * wsz + mid_p * c_p * wsz  # w2, fused head (single buf)
        + 2 * tm * c_p * 4                        # out slab, double-buffered
        + tm * mid_p * 4                          # h1_acc scratch
        + tm * (mid_p * (2 * wsz + 4) + c_p * 4)  # epilogue temporaries (rough)
        + (3 * mid_p + c_p) * 4                   # biases
    )
    resident = resident_bytes <= int(vmem_limit * 0.7)

    if resident:
        tk_eff, k_p, k_tiles = k128, k128, 1
    else:
        k_tiles = _cdiv(k128, min(tk, k128))
        tk_eff = _round_up(_cdiv(k128, k_tiles), 128)
        k_p = tk_eff * k_tiles

    # ---- operand prep (zero-padded so padding is exact) --------------------
    def pad2(a, rows, cols, dtype):
        a = a.astype(dtype)
        pr, pc = rows - a.shape[0], cols - a.shape[1]
        if pr or pc:
            a = jnp.pad(a, ((0, pr), (0, pc)))
        return a

    x_p = pad2(x2, n_p, k_p, x2.dtype)            # keep dtype; cast in-kernel
    w1 = pad2(params["w1"], k_p, mid_p, compute_dtype)
    w2 = pad2(params["w2"], mid_p, mid_p, compute_dtype)
    wh = pad2(jnp.concatenate([params["w_cls"], params["w_bbox"]], axis=1),
              mid_p, c_p, compute_dtype)
    b1 = pad2(params["b1"], 1, mid_p, jnp.float32)
    b2 = pad2(params["b2"], 1, mid_p, jnp.float32)
    bh = pad2(jnp.concatenate([params["b_cls"], params["b_bbox"]], axis=1),
              1, c_p, jnp.float32)

    # ---- block specs --------------------------------------------------------
    single = pl.Buffered(1)                       # constant-index operands
    w1_kwargs = dict(pipeline_mode=single) if k_tiles == 1 else {}
    in_specs = [
        pl.BlockSpec((tm, tk_eff), lambda i, kk: (i, kk)),               # x slab
        pl.BlockSpec((tk_eff, mid_p), lambda i, kk: (kk, 0), **w1_kwargs),  # w1
        pl.BlockSpec((1, mid_p), lambda i, kk: (0, 0), pipeline_mode=single),   # b1
        pl.BlockSpec((mid_p, mid_p), lambda i, kk: (0, 0), pipeline_mode=single),  # w2
        pl.BlockSpec((1, mid_p), lambda i, kk: (0, 0), pipeline_mode=single),   # b2
        pl.BlockSpec((mid_p, c_p), lambda i, kk: (0, 0), pipeline_mode=single),  # head W
        pl.BlockSpec((1, c_p), lambda i, kk: (0, 0), pipeline_mode=single),     # head b
    ]
    out_specs = pl.BlockSpec((tm, c_p), lambda i, kk: (i, 0))

    # ---- advisory cost (count w1 once per actual fetch) ---------------------
    w1_fetches = 1 if k_tiles == 1 else n_tiles
    flops = 2 * n_p * (k_p * mid_p + mid_p * mid_p + mid_p * c_p)
    bytes_accessed = (
        x_p.size * x_sz
        + w1_fetches * w1.size * wsz
        + (w2.size + wh.size) * wsz
        + 4 * (b1.size + b2.size + bh.size)
        + 4 * n_p * c_p
    )
    cost = pl.CostEstimate(flops=int(flops), transcendentals=0,
                           bytes_accessed=int(bytes_accessed))

    out = pl.pallas_call(
        _fast_rcnn_predictor_kernel,
        out_shape=jax.ShapeDtypeStruct((n_p, c_p), jnp.float32),
        grid_spec=pltpu.PrefetchScalarGridSpec(
            num_scalar_prefetch=0,
            grid=(n_tiles, k_tiles),
            in_specs=in_specs,
            out_specs=out_specs,
            scratch_shapes=[pltpu.VMEM((tm, mid_p), jnp.float32)],
        ),
        compiler_params=pltpu.CompilerParams(
            dimension_semantics=("parallel", "arbitrary"),
            vmem_limit_bytes=int(vmem_limit),
        ),
        cost_estimate=cost,
    )(x_p, w1, b1, w2, b2, wh, bh)

    score = out[:n, :num_classes]
    bbox_delta = out[:n, num_classes:c_out]
    return score, bbox_delta


def init_params(key, in_channels, mid_channels, num_classes, dtype=jnp.float32):
    """Deterministic synthetic parameters matching nn.Linear shapes.
    Stored transposed relative to PyTorch: W has shape (in, out)."""
    ks = jax.random.split(key, 8)

    def linear(kw, kb, fan_in, fan_out):
        bound = 1.0 / jnp.sqrt(fan_in)
        w = jax.random.uniform(kw, (fan_in, fan_out), dtype, -bound, bound)
        b = jax.random.uniform(kb, (1, fan_out), dtype, -bound, bound)
        return w, b

    w1, b1 = linear(ks[0], ks[1], in_channels, mid_channels)
    w2, b2 = linear(ks[2], ks[3], mid_channels, mid_channels)
    w_cls, b_cls = linear(ks[4], ks[5], mid_channels, num_classes)
    w_bbox, b_bbox = linear(ks[6], ks[7], mid_channels, num_classes * 4)
    return dict(w1=w1, b1=b1, w2=w2, b2=b2,
                w_cls=w_cls, b_cls=b_cls, w_bbox=w_bbox, b_bbox=b_bbox)


if __name__ == "__main__":
    key = jax.random.PRNGKey(0)
    k_x, k_p = jax.random.split(key)

    # Small RoI-head-like shapes: 8 RoIs, pooled feature 4x4x4 -> in_channels=64.
    num_rois = 8
    c, h, w = 4, 4, 4
    in_channels = c * h * w           # 64
    mid_channels = 32
    num_classes = 5

    x = jax.random.normal(k_x, (num_rois, c, h, w), jnp.float32)
    params = init_params(k_p, in_channels, mid_channels, num_classes)

    score, bbox_delta = fast_rcnn_predictor(x, params)
    jax.block_until_ready((score, bbox_delta))

    # Pure-JAX reference using the same bf16-matmul / f32-accumulate precision.
    def bdot(a, wgt):
        return jnp.dot(a.astype(jnp.bfloat16), wgt.astype(jnp.bfloat16),
                       preferred_element_type=jnp.float32)

    xf = x.reshape(num_rois, -1)
    hh = jnp.maximum(bdot(xf, params["w1"]) + params["b1"], 0.0)
    hh = jnp.maximum(bdot(hh, params["w2"]) + params["b2"], 0.0)
    ref_score = bdot(hh, params["w_cls"]) + params["b_cls"]
    ref_bbox = bdot(hh, params["w_bbox"]) + params["b_bbox"]

    assert score.shape == (num_rois, num_classes)
    assert bbox_delta.shape == (num_rois, num_classes * 4)
    assert jnp.allclose(score, ref_score, atol=2e-2, rtol=2e-2)
    assert jnp.allclose(bbox_delta, ref_bbox, atol=2e-2, rtol=2e-2)

    print("KERNEL_OK")
</pallas_src>

<mosaic_0001>
module attributes {stable_mosaic.version = 11 : i64} {
  func.func @_fast_rcnn_predictor_kernel(%arg0: i32, %arg1: i32, %arg2: memref<16x128xf32, #tpu.memory_space<vmem>>, %arg3: memref<128x128xbf16, #tpu.memory_space<vmem>>, %arg4: memref<1x128xf32, #tpu.memory_space<vmem>>, %arg5: memref<128x128xbf16, #tpu.memory_space<vmem>>, %arg6: memref<1x128xf32, #tpu.memory_space<vmem>>, %arg7: memref<128x128xbf16, #tpu.memory_space<vmem>>, %arg8: memref<1x128xf32, #tpu.memory_space<vmem>>, %arg9: memref<16x128xf32, #tpu.memory_space<vmem>>, %arg10: memref<16x128xf32, #tpu.memory_space<vmem>>) attributes {dimension_semantics = [#tpu.dimension_semantics<parallel>, #tpu.dimension_semantics<arbitrary>], iteration_bounds = array<i64: 1, 1>, scalar_prefetch = 0 : i64, scratch_operands = 1 : i64, tpu.core_type = #tpu.core_type<tc>, window_params = [{transform_indices = @transform_0, window_bounds = array<i64: 16, 128>}, {pipeline_mode = #tpu.pipeline_mode<synchronous>, transform_indices = @transform_1, window_bounds = array<i64: 128, 128>}, {pipeline_mode = #tpu.pipeline_mode<synchronous>, transform_indices = @transform_2, window_bounds = array<i64: 1, 128>}, {pipeline_mode = #tpu.pipeline_mode<synchronous>, transform_indices = @transform_3, window_bounds = array<i64: 128, 128>}, {pipeline_mode = #tpu.pipeline_mode<synchronous>, transform_indices = @transform_4, window_bounds = array<i64: 1, 128>}, {pipeline_mode = #tpu.pipeline_mode<synchronous>, transform_indices = @transform_5, window_bounds = array<i64: 128, 128>}, {pipeline_mode = #tpu.pipeline_mode<synchronous>, transform_indices = @transform_6, window_bounds = array<i64: 1, 128>}, {transform_indices = @transform_7, window_bounds = array<i64: 16, 128>}]} {
    %c0_i32 = arith.constant 0 : i32
    %0 = arith.cmpi eq, %arg1, %c0_i32 : i32
    %1 = arith.extui %0 : i1 to i32
    %c0_i32_0 = arith.constant 0 : i32
    %2 = arith.cmpi ne, %1, %c0_i32_0 : i32
    scf.if %2 {
      %c0_10 = arith.constant 0 : index
      %c0_11 = arith.constant 0 : index
      %13 = vector.load %arg4[%c0_10, %c0_11] : memref<1x128xf32, #tpu.memory_space<vmem>>, vector<1x128xf32>
      %14 = vector.shape_cast %13 : vector<1x128xf32> to vector<1x128xf32>
      %15 = vector.broadcast %14 : vector<1x128xf32> to vector<16x128xf32>
      %c0_12 = arith.constant 0 : index
      %c0_13 = arith.constant 0 : index
      %16 = vector.load %arg10[%c0_12, %c0_13] : memref<16x128xf32, #tpu.memory_space<vmem>>, vector<16x128xf32>
      tpu.vector_store %arg10[%c0_12, %c0_13], %15 {strides = array<i32>} : memref<16x128xf32, #tpu.memory_space<vmem>>, vector<16x128xf32>,
    } else {
    }
    %c0 = arith.constant 0 : index
    %c0_1 = arith.constant 0 : index
    %3 = vector.load %arg10[%c0, %c0_1] : memref<16x128xf32, #tpu.memory_space<vmem>>, vector<16x128xf32>
    %c0_2 = arith.constant 0 : index
    %c0_3 = arith.constant 0 : index
    %4 = vector.load %arg2[%c0_2, %c0_3] : memref<16x128xf32, #tpu.memory_space<vmem>>, vector<16x128xf32>
    %5 = arith.truncf %4 : vector<16x128xf32> to vector<16x128xbf16>
    %c0_4 = arith.constant 0 : index
    %c0_5 = arith.constant 0 : index
    %6 = vector.load %arg3[%c0_4, %c0_5] : memref<128x128xbf16, #tpu.memory_space<vmem>>, vector<128x128xbf16>
    %cst = arith.constant dense<0.000000e+00> : vector<16x128xf32>
    %7 = tpu.matmul %5, %6, %cst {dimension_numbers = #tpu.dot_dimension_numbers<[1], [0], [0], [1], [0, 0, 1, 1], [], []>} : vector<16x128xbf16>, vector<128x128xbf16>, vector<16x128xf32> -> vector<16x128xf32>
    %8 = arith.addf %3, %7 : vector<16x128xf32>
    %c0_6 = arith.constant 0 : index
    %c0_7 = arith.constant 0 : index
    %9 = vector.load %arg10[%c0_6, %c0_7] : memref<16x128xf32, #tpu.memory_space<vmem>>, vector<16x128xf32>
    tpu.vector_store %arg10[%c0_6, %c0_7], %8 {strides = array<i32>} : memref<16x128xf32, #tpu.memory_space<vmem>>, vector<16x128xf32>,
    %c0_i32_8 = arith.constant 0 : i32
    %10 = arith.cmpi eq, %arg1, %c0_i32_8 : i32
    %11 = arith.extui %10 : i1 to i32
    %c0_i32_9 = arith.constant 0 : i32
    %12 = arith.cmpi ne, %11, %c0_i32_9 : i32
    scf.if %12 {
      %c0_10 = arith.constant 0 : index
      %c0_11 = arith.constant 0 : index
      %13 = vector.load %arg10[%c0_10, %c0_11] : memref<16x128xf32, #tpu.memory_space<vmem>>, vector<16x128xf32>
      %cst_12 = arith.constant 0.000000e+00 : f32
      %14 = vector.broadcast %cst_12 : f32 to vector<16x128xf32>
      %15 = arith.maximumf %13, %14 : vector<16x128xf32>
      %16 = arith.truncf %15 : vector<16x128xf32> to vector<16x128xbf16>
      %c0_13 = arith.constant 0 : index
      %c0_14 = arith.constant 0 : index
      %17 = vector.load %arg5[%c0_13, %c0_14] : memref<128x128xbf16, #tpu.memory_space<vmem>>, vector<128x128xbf16>
      %cst_15 = arith.constant dense<0.000000e+00> : vector<16x128xf32>
      %18 = tpu.matmul %16, %17, %cst_15 {dimension_numbers = #tpu.dot_dimension_numbers<[1], [0], [0], [1], [0, 0, 1, 1], [], []>} : vector<16x128xbf16>, vector<128x128xbf16>, vector<16x128xf32> -> vector<16x128xf32>
      %c0_16 = arith.constant 0 : index
      %c0_17 = arith.constant 0 : index
      %19 = vector.load %arg6[%c0_16, %c0_17] : memref<1x128xf32, #tpu.memory_space<vmem>>, vector<1x128xf32>
      %20 = vector.broadcast %19 : vector<1x128xf32> to vector<16x128xf32>
      %21 = arith.addf %18, %20 : vector<16x128xf32>
      %cst_18 = arith.constant 0.000000e+00 : f32
      %22 = vector.broadcast %cst_18 : f32 to vector<16x128xf32>
      %23 = arith.maximumf %21, %22 : vector<16x128xf32>
      %24 = arith.truncf %23 : vector<16x128xf32> to vector<16x128xbf16>
      %c0_19 = arith.constant 0 : index
      %c0_20 = arith.constant 0 : index
      %25 = vector.load %arg7[%c0_19, %c0_20] : memref<128x128xbf16, #tpu.memory_space<vmem>>, vector<128x128xbf16>
      %cst_21 = arith.constant dense<0.000000e+00> : vector<16x128xf32>
      %26 = tpu.matmul %24, %25, %cst_21 {dimension_numbers = #tpu.dot_dimension_numbers<[1], [0], [0], [1], [0, 0, 1, 1], [], []>} : vector<16x128xbf16>, vector<128x128xbf16>, vector<16x128xf32> -> vector<16x128xf32>
      %c0_22 = arith.constant 0 : index
      %c0_23 = arith.constant 0 : index
      %27 = vector.load %arg8[%c0_22, %c0_23] : memref<1x128xf32, #tpu.memory_space<vmem>>, vector<1x128xf32>
      %28 = vector.broadcast %27 : vector<1x128xf32> to vector<16x128xf32>
      %29 = arith.addf %26, %28 : vector<16x128xf32>
      %c0_24 = arith.constant 0 : index
      %c0_25 = arith.constant 0 : index
      %30 = vector.load %arg9[%c0_24, %c0_25] : memref<16x128xf32, #tpu.memory_space<vmem>>, vector<16x128xf32>
      tpu.vector_store %arg9[%c0_24, %c0_25], %29 {strides = array<i32>} : memref<16x128xf32, #tpu.memory_space<vmem>>, vector<16x128xf32>,
    } else {
    }
    return
  }
  func.func @transform_0(%arg0: i32, %arg1: i32) -> (i32, i32) {
    %c0_i32 = arith.constant 0 : i32
    return %arg0, %arg1 : i32, i32
  }
  func.func @transform_1(%arg0: i32, %arg1: i32) -> (i32, i32) {
    %c0_i32 = arith.constant 0 : i32
    %c0_i32_0 = arith.constant 0 : i32
    return %arg1, %c0_i32 : i32, i32
  }
  func.func @transform_2(%arg0: i32, %arg1: i32) -> (i32, i32) {
    %c0_i32 = arith.constant 0 : i32
    %c0_i32_0 = arith.constant 0 : i32
    %c0_i32_1 = arith.constant 0 : i32
    return %c0_i32, %c0_i32_0 : i32, i32
  }
  func.func @transform_3(%arg0: i32, %arg1: i32) -> (i32, i32) {
    %c0_i32 = arith.constant 0 : i32
    %c0_i32_0 = arith.constant 0 : i32
    %c0_i32_1 = arith.constant 0 : i32
    return %c0_i32, %c0_i32_0 : i32, i32
  }
  func.func @transform_4(%arg0: i32, %arg1: i32) -> (i32, i32) {
    %c0_i32 = arith.constant 0 : i32
    %c0_i32_0 = arith.constant 0 : i32
    %c0_i32_1 = arith.constant 0 : i32
    return %c0_i32, %c0_i32_0 : i32, i32
  }
  func.func @transform_5(%arg0: i32, %arg1: i32) -> (i32, i32) {
    %c0_i32 = arith.constant 0 : i32
    %c0_i32_0 = arith.constant 0 : i32
    %c0_i32_1 = arith.constant 0 : i32
    return %c0_i32, %c0_i32_0 : i32, i32
  }
  func.func @transform_6(%arg0: i32, %arg1: i32) -> (i32, i32) {
    %c0_i32 = arith.constant 0 : i32
    %c0_i32_0 = arith.constant 0 : i32
    %c0_i32_1 = arith.constant 0 : i32
    return %c0_i32, %c0_i32_0 : i32, i32
  }
  func.func @transform_7(%arg0: i32, %arg1: i32) -> (i32, i32) {
    %c0_i32 = arith.constant 0 : i32
    %c0_i32_0 = arith.constant 0 : i32
    return %arg0, %c0_i32 : i32, i32
  }
}

</mosaic_0001>

<bundles_post_ra>
// kernel: tpu_custom_call.1
= control target key start
LH: loop header
LB: loop body
LE: loop exit
PB: predicated region body
PF: predicated region fallthrough
CT: control target
= control target key end

     0   :  { %12 = vsyncpa [#allocation4], 0  ;;  %s724_s0 = inlined_call_operand.hbm [shape: f32[16,128], index: 0, kind: input, shape index: {}]   ;;  %s725_s1 = inlined_call_operand.hbm [shape: bf16[128,128], index: 1, kind: input, shape index: {}]   ;;  %s726_s2 = inlined_call_operand.vmem [shape: f32[1,128], index: 2, kind: input, shape index: {}]   ;;  %s727_s3 = inlined_call_operand.hbm [shape: bf16[128,128], index: 3, kind: input, shape index: {}]   ;;  %s728_s4 = inlined_call_operand.vmem [shape: f32[1,128], index: 4, kind: input, shape index: {}]   ;;  %s729_s5 = inlined_call_operand.hbm [shape: bf16[128,128], index: 5, kind: input, shape index: {}]   ;;  %s730_s6 = inlined_call_operand.vmem [shape: f32[1,128], index: 6, kind: input, shape index: {}]   ;;  %s731_s7 = inlined_call_operand.hbm [shape: f32[16,128], index: 7, kind: output, shape index: {}]  }
   0x1   :  { %13 = vsyncpa [#allocation7], 0 }
   0x2   :  { %14 = vsyncpa [#allocation10], 0  ;;  %s33_s26 = sshll.u32 %s725_s1, 4  ;;  %s34_s26 = int_to_ptr.hbm [resolvable:$true] %s33_s26 }
   0x3   :  { %15 = vsyncpa [#allocation5], 0  ;;  %s645_s27 = smov [#allocation6]   ;;  %s20_s8 = sshll.u32 %s724_s0, 4  ;;  %s21_s8 = int_to_ptr.hbm [resolvable:$true] %s20_s8 }
   0x4   :  { %s35_s28 = sshll.u32 %s645_s27, 4  ;;  %s646_s9 = smov 64   ;;  %s36_s28 = int_to_ptr.vmem [resolvable:$true] %s35_s28 }
   0x5   :  { %s647_s10 = smov 4   ;;  %s648_s11 = smov [#allocation3]  }
   0x6   :  { %41 = dma.hbm_to_vmem [thread:$0]  %s34_s26, 1024, %s36_s28, [#allocation7], %s646_s9, %s646_s9, %s647_s10  }
   0x7   :  { %s22_s12 = sshll.u32 %s648_s11, 4  ;;  %s649_s13 = smov 128   ;;  %s23_s12 = int_to_ptr.vmem [resolvable:$true] %s22_s12 }
   0x8   :  { %s650_s14 = smov 8   ;;  %s48_s16 = sshll.u32 %s727_s3, 4  ;;  %s49_s16 = int_to_ptr.hbm [resolvable:$true] %s48_s16 }
   0x9   :  { %28 = dma.hbm_to_vmem [thread:$0]  %s21_s8, 256, %s23_s12, [#allocation4], %s649_s13, %s649_s13, %s650_s14  }
   0xa   :  { %s651_s17 = smov [#allocation8]   ;;  %s63_s20 = sshll.u32 %s729_s5, 4  ;;  %s64_s20 = int_to_ptr.hbm [resolvable:$true] %s63_s20 }
   0xb   :  { %s50_s0 = sshll.u32 %s651_s17, 4  ;;  %s652_s21 = smov [#allocation9]   ;;  %s51_s0 = int_to_ptr.vmem [resolvable:$true] %s50_s0 }
   0xc   :  { %56 = dma.hbm_to_vmem [thread:$0]  %s49_s16, 1024, %s51_s0, [#allocation7], %s646_s9, %s646_s9, %s647_s10  }
   0xd   :  { %s65_s22 = sshll.u32 %s652_s21, 4  ;;  %s66_s22 = int_to_ptr.vmem [resolvable:$true] %s65_s22 }
   0xe   :  { %71 = dma.hbm_to_vmem [thread:$0]  %s64_s20, 1024, %s66_s22, [#allocation10], %s646_s9, %s646_s9, %s647_s10  }
   0xf   :  { %637 = dma.done.wait [#allocation4], 256  }
  0x10   :  { %638 = vsyncadd [#allocation4], 4294967040 }
  0x11   :  { %639 = dma.done.wait [#allocation7], 2048  }
  0x12   :  { %640 = vsyncadd [#allocation7], 4294965248 }
  0x13   :  { %641 = dma.done.wait [#allocation10], 1024  }
  0x14   :  { %642 = vsyncadd [#allocation10], 4294966272  ;;  %v488_v0 = vld [vmem:[#allocation6 + $0x38] sm:$0xff]  ;;  %v487_v1 = vld [vmem:[#allocation6 + $0x30] sm:$0xff]  ;;  %s653_s26 = smov [#allocation11]  }
  0x15   :  { %169 = vmatpush.bf16.msra.mxu0 %v488_v0  ;;  %v496_v2 = vld [vmem:[#allocation8 + $0x38] sm:$0xff]  ;;  %v495_v3 = vld [vmem:[#allocation8 + $0x30] sm:$0xff]  ;;  %v486_v4 = vld [vmem:[#allocation6 + $0x28] sm:$0xff]  ;;  %s368_s27 = sshll.u32 %s653_s26, 4  ;;  %s369_s27 = int_to_ptr.vmem [resolvable:$true] %s368_s27 }
  0x16   :  { %263 = vmatpush.bf16.msra.mxu1 %v496_v2  ;;  %v494_v5 = vld [vmem:[#allocation8 + $0x28] sm:$0xff]  ;;  %v485_v6 = vld [vmem:[#allocation6 + $0x20] sm:$0xff]  ;;  %v484_v8 = vld [vmem:[#allocation6 + $0x18] sm:$0xff] }
  0x17   :  { %v493_v7 = vld [vmem:[#allocation8 + $0x20] sm:$0xff]  ;;  %v483_v9 = vld [vmem:[#allocation6 + $0x10] sm:$0xff]  ;;  %v482_v10 = vld [vmem:[#allocation6 + $0x8] sm:$0xff] }
  0x18   :  { %v481_v11 = vld [vmem:[#allocation6] sm:$0xff]  ;;  %v102_v12 = vld [vmem:[#allocation3] sm:$0xff]  ;;  %v103_v13 = vld [vmem:[#allocation3 + $0x8] sm:$0xff] }
  0x19   :  { %170 = vmatpush.bf16.msra.mxu0 %v487_v1  ;;  %v104_v14 = vpack.c.bf16 %v103_v13, %v102_v12  ;;  %v492_v15 = vld [vmem:[#allocation8 + $0x18] sm:$0xff]  ;;  %v491_v16 = vld [vmem:[#allocation8 + $0x10] sm:$0xff]  ;;  %v490_v17 = vld [vmem:[#allocation8 + $0x8] sm:$0xff] }
  0x1a   :  { %264 = vmatpush.bf16.msra.mxu1 %v495_v3  ;;  %v489_v18 = vld [vmem:[#allocation8] sm:$0xff]  ;;  %v504_v19 = vld [vmem:[#allocation9 + $0x38] sm:$0xff]  ;;  %v503_v20 = vld [vmem:[#allocation9 + $0x30] sm:$0xff] }
  0x1b   :  { %348 = vmatpush.bf16.msra.mxu2 %v504_v19  ;;  %v502_v21 = vld [vmem:[#allocation9 + $0x28] sm:$0xff]  ;;  %v501_v22 = vld [vmem:[#allocation9 + $0x20] sm:$0xff]  ;;  %v514_v24 = vld [vmem:[%s726_s2] ss:$0 sm:$0xff] }
  0x1c   :  { %v500_v31 = vld [vmem:[#allocation9 + $0x18] sm:$0xff]  ;;  %v499_v32 = vld [vmem:[#allocation9 + $0x10] sm:$0xff]  ;;  %v498_v33 = vld [vmem:[#allocation9 + $0x8] sm:$0xff] }
  0x1d   :  { %171 = vmatpush.bf16.msra.mxu0 %v486_v4  ;;  %v497_v34 = vld [vmem:[#allocation9] sm:$0xff]  ;;  %v515_v36 = vld [vmem:[%s728_s4] ss:$0 sm:$0xff]  ;;  %s370_s4 = sshll.u32 %s731_s7, 4  ;;  %s371_s4 = int_to_ptr.hbm [resolvable:$true] %s370_s4 }
  0x1e   :  { %265 = vmatpush.bf16.msra.mxu1 %v494_v5  ;;  %v516_v43 = vld [vmem:[%s730_s6] ss:$0 sm:$0xff] }
  0x1f   :  { %349 = vmatpush.bf16.msra.mxu2 %v503_v20 }
  0x21   :  { %172 = vmatpush.bf16.msra.mxu0 %v485_v6 }
  0x22   :  { %266 = vmatpush.bf16.msra.mxu1 %v493_v7 }
  0x23   :  { %350 = vmatpush.bf16.msra.mxu2 %v502_v21 }
  0x25   :  { %173 = vmatpush.bf16.msra.mxu0 %v484_v8 }
  0x26   :  { %267 = vmatpush.bf16.msra.mxu1 %v492_v15 }
  0x27   :  { %351 = vmatpush.bf16.msra.mxu2 %v501_v22 }
  0x29   :  { %174 = vmatpush.bf16.msra.mxu0 %v483_v9 }
  0x2a   :  { %268 = vmatpush.bf16.msra.mxu1 %v491_v16 }
  0x2b   :  { %352 = vmatpush.bf16.msra.mxu2 %v500_v31 }
  0x2d   :  { %175 = vmatpush.bf16.msra.mxu0 %v482_v10 }
  0x2e   :  { %269 = vmatpush.bf16.msra.mxu1 %v490_v17 }
  0x2f   :  { %353 = vmatpush.bf16.msra.mxu2 %v499_v32 }
  0x31   :  { %176 = vmatpush.bf16.msra.mxu0 %v481_v11 }
  0x32   :  { %270 = vmatpush.bf16.msra.mxu1 %v489_v18 }
  0x33   :  { %354 = vmatpush.bf16.msra.mxu2 %v498_v33 }
  0x34   :  { %177 = vmatmul.bf16.vlgmr.msra.gmra.mxu0 %v104_v14 }
  0x37   :  { %355 = vmatpush.bf16.msra.mxu2 %v497_v34 }
  0xb1   :  { %v178_v23 = vpop.f32.mrf.mxu0 }
  0xb2   :  { %v183_v25 = vadd.f32 %v514_v24, %v178_v23 }
  0xb4   :  { %v192_v28 = vmax.f32 %v183_v25, 0.0 }
  0xb9   :  { %v180_v26 = vpop.f32.mrf.mxu0 }
  0xba   :  { %v184_v27 = vadd.f32 %v514_v24, %v180_v26 }
  0xbc   :  { %v193_v29 = vmax.f32 %v184_v27, 0.0 }
  0xbe   :  { %v194_v30 = vpack.c.bf16 %v193_v29, %v192_v28 }
  0xc0   :  { %271 = vmatmul.bf16.vlgmr.msra.gmra.mxu1 %v194_v30 }
 0x13d   :  { %v272_v35 = vpop.f32.mrf.mxu1 }
 0x13e   :  { %v273_v37 = vadd.f32 %v515_v36, %v272_v35 }
 0x140   :  { %v277_v40 = vmax.f32 %v273_v37, 0.0 }
 0x145   :  { %v274_v38 = vpop.f32.mrf.mxu1 }
 0x146   :  { %v275_v39 = vadd.f32 %v515_v36, %v274_v38 }
 0x148   :  { %v278_v41 = vmax.f32 %v275_v39, 0.0 }
 0x14a   :  { %v279_v42 = vpack.c.bf16 %v278_v41, %v277_v40 }
 0x14c   :  { %356 = vmatmul.bf16.vlgmr.msra.gmra.mxu2 %v279_v42 }
 0x1cf   :  { %v357_v44 = vpop.f32.mrf.mxu2 }
 0x1d0   :  { %v358_v45 = vadd.f32 %v516_v43, %v357_v44 }
 0x1d2   :  { %362 = vst [vmem:[#allocation11] sm:$0xff] %v358_v45 }
 0x1d7   :  { %v359_v46 = vpop.f32.mrf.mxu2 }
 0x1d8   :  { %v360_v47 = vadd.f32 %v516_v43, %v359_v46 }
 0x1da   :  { %363 = vst [vmem:[#allocation11 + $0x8] sm:$0xff] %v360_v47 }
 0x1db   :  { %376 = dma.vmem_to_hbm [thread:$0]  %s369_s27, 256, %s371_s4, [#allocation5], %s649_s13, %s649_s13, %s650_s14  }
 0x1dc   :  { %643 = dma.done.wait [#allocation5], 256  }
 0x1dd   :  { %644 = vsyncadd [#allocation5], 4294967040 }
 0x1de   :  { %381 = vsyncpa [#allocation4], 1 }
 0x1df   :  { %382 = vsyncpa [#allocation7], 1 }
 0x1e0   :  { %383 = vsyncpa [#allocation10], 1 }
 0x1e1   :  { %384 = vsyncpa [#allocation5], 1 }

</bundles_post_ra>
